<compile_context>
chip_gen: v7x
topology: tpu7x:2x2x1
jax: 0.10.0
libtpu: 0.0.40
codegen_flags: <defaults>
</compile_context>

<pallas_src>
import jax
import jax.numpy as jnp
from jax.experimental import pallas as pl
from jax.experimental.pallas import tpu as pltpu


_TILE_BYTES = 8 * 1024 * 1024       # per-buffer VMEM tile target (f32 bytes)
_VMEM_LIMIT = 48 * 1024 * 1024      # scoped-VMEM request (headroom on v7x's 64 MiB)


def _round_up(x, m):
    return (x + m - 1) // m * m


# ----------------------------- kernels -------------------------------------


def _planar_fwd_kernel_rows(x_ref, w_ref, u_ref, b_ref, o_ref):
    """Row layout: dim on lanes.  Used when D is a multiple of 128.

    x_ref : (bm, D) VMEM   w_ref, u_ref : (1, D) VMEM   b_ref : (1,) SMEM
    """
    x = x_ref[...]                                              # (bm, D)
    w = w_ref[...]                                              # (1, D)
    u = u_ref[...]                                              # (1, D)
    # a = x @ w.T + b as VPU multiply + lane reduce (no MXU, no transpose).
    a = jnp.sum(x * w, axis=-1, keepdims=True) + b_ref[0]       # (bm, 1)
    o_ref[...] = (x + u * jnp.tanh(a)).astype(o_ref.dtype)


def _planar_fwd_kernel_cols(xt_ref, wt_ref, ut_ref, b_ref, ot_ref):
    """Column (transposed) layout: batch on lanes.  Used for small / odd D.

    xt_ref : (D, bn) VMEM   wt_ref, ut_ref : (D, 1) VMEM   b_ref : (1,) SMEM
    """
    xt = xt_ref[...]                                            # (D, bn)
    wt = wt_ref[...]                                            # (D, 1)
    ut = ut_ref[...]                                            # (D, 1)
    a = jnp.sum(xt * wt, axis=0, keepdims=True) + b_ref[0]      # (1, bn)
    ot_ref[...] = (xt + ut * jnp.tanh(a)).astype(ot_ref.dtype)


# ----------------------------- wrapper --------------------------------------


def _adjust_u(u, w):
    """JAX equivalent of PlanarTransformation.adjust_u (applied iff u.w < -1)."""
    wu = jnp.dot(u, w.T)                                        # (1, 1)
    m_wu = -1.0 + jax.nn.softplus(wu)                           # stable softplus
    w_norm_sq = jnp.sum(w * w, axis=1, keepdims=True)           # (1, 1)
    u_adj = u + (m_wu - wu) * w / w_norm_sq
    return jnp.where(wu[0, 0] < -1.0, u_adj, u)


def _cost_estimate(B, D):
    return pl.CostEstimate(
        flops=4 * B * D,
        transcendentals=B,
        bytes_accessed=(2 * B * D + 2 * D + 1) * 4,
    )


def _compiler_params():
    return pltpu.CompilerParams(
        dimension_semantics=("parallel",),
        vmem_limit_bytes=_VMEM_LIMIT,
    )


def _forward_rows(x, w, u_eff, b):
    """D is a multiple of 128: (B, D) layout is already lane-dense."""
    B, D = x.shape
    bm_cap = max(8, (_TILE_BYTES // (D * 4)) // 8 * 8)
    bm = min(bm_cap, _round_up(B, 8))
    if B > 16:                       # keep >=2 grid steps (v7x megacore)
        bm = min(bm, _round_up(pl.cdiv(B, 2), 8))
    bm = max(bm, 8)

    B_pad = _round_up(B, bm)
    x_p = jnp.pad(x, ((0, B_pad - B), (0, 0))) if B_pad != B else x

    out = pl.pallas_call(
        _planar_fwd_kernel_rows,
        out_shape=jax.ShapeDtypeStruct((B_pad, D), x.dtype),
        grid=(B_pad // bm,),
        in_specs=[
            pl.BlockSpec((bm, D), lambda i: (i, 0)),             # x tile
            pl.BlockSpec((1, D), lambda i: (0, 0)),              # w (broadcast)
            pl.BlockSpec((1, D), lambda i: (0, 0)),              # u (broadcast)
            pl.BlockSpec(memory_space=pltpu.MemorySpace.SMEM),   # b scalar
        ],
        out_specs=pl.BlockSpec((bm, D), lambda i: (i, 0)),
        compiler_params=_compiler_params(),
        cost_estimate=_cost_estimate(B_pad, D),
    )(x_p, w, u_eff, b)
    return out[:B] if B_pad != B else out


def _forward_cols(x, w, u_eff, b):
    """Small / odd D: batch maps to the 128-wide lane axis (lane-dense)."""
    B, D = x.shape
    d_pad = _round_up(D, 8)          # sublane padding of the (D, bn) tile
    bn_cap = max(128, (_TILE_BYTES // (d_pad * 4)) // 128 * 128)
    bn = min(bn_cap, _round_up(B, 128))
    if B > 256:                      # keep >=2 grid steps (v7x megacore)
        bn = min(bn, _round_up(pl.cdiv(B, 2), 128))
    bn = max(bn, 128)

    B_pad = _round_up(B, bn)
    # Wrapper-side transpose/pad is layout plumbing only; compute stays in-kernel.
    x_t = jnp.pad(x.T, ((0, 0), (0, B_pad - B))) if B_pad != B else x.T
    w_t = w.T                                                   # (D, 1)
    u_t = u_eff.T                                               # (D, 1)

    out_t = pl.pallas_call(
        _planar_fwd_kernel_cols,
        out_shape=jax.ShapeDtypeStruct((D, B_pad), x.dtype),
        grid=(B_pad // bn,),
        in_specs=[
            pl.BlockSpec((D, bn), lambda i: (0, i)),             # x^T tile
            pl.BlockSpec((D, 1), lambda i: (0, 0)),              # w^T (broadcast)
            pl.BlockSpec((D, 1), lambda i: (0, 0)),              # u^T (broadcast)
            pl.BlockSpec(memory_space=pltpu.MemorySpace.SMEM),   # b scalar
        ],
        out_specs=pl.BlockSpec((D, bn), lambda i: (0, i)),
        compiler_params=_compiler_params(),
        cost_estimate=_cost_estimate(B_pad, D),
    )(x_t, w_t, u_t, b)
    out_t = out_t[:, :B] if B_pad != B else out_t
    return out_t.T


@jax.jit
def planar_transformation(x, u, w, b):
    """Forward pass of the planar flow layer.

    x : (B, D) float32;  u, w : (1, D) float32;  b : (1,) float32
    returns (B, D) float32
    """
    u_eff = _adjust_u(u, w)          # invertibility fixup (tiny, stays in XLA)
    _, D = x.shape
    if D % 128 == 0:
        return _forward_rows(x, w, u_eff, b)
    return _forward_cols(x, w, u_eff, b)


# ----------------------------- reference & test ------------------------------


def _reference(x, u, w, b):
    """Pure-JAX reference matching the PyTorch forward."""
    u_eff = _adjust_u(u, w)
    a = jnp.dot(x, w.T) + b
    return x + u_eff * jnp.tanh(a)


if __name__ == "__main__":
    key = jax.random.PRNGKey(0)
    k_x, k_u, k_w, k_x2, k_u2, k_w2 = jax.random.split(key, 6)

    # --- Case 1: module defaults (dim=2) -> transposed, lane-dense path ---
    batch, dim = 8, 2
    u = 0.01 * jax.random.normal(k_u, (1, dim), dtype=jnp.float32)
    w = 0.01 * jax.random.normal(k_w, (1, dim), dtype=jnp.float32)
    b = jnp.zeros((1,), dtype=jnp.float32)
    x = jax.random.normal(k_x, (batch, dim), dtype=jnp.float32)

    out = jax.block_until_ready(planar_transformation(x, u, w, b))
    ref = _reference(x, u, w, b)
    assert out.shape == (batch, dim)
    assert jnp.allclose(out, ref, atol=1e-5, rtol=1e-5), "mismatch (dim=2)"

    # --- Case 2: lane-aligned dim -> row-layout path, multi-step grid ---
    batch2, dim2 = 256, 128
    u2 = 0.01 * jax.random.normal(k_u2, (1, dim2), dtype=jnp.float32)
    w2 = 0.01 * jax.random.normal(k_w2, (1, dim2), dtype=jnp.float32)
    b2 = jnp.full((1,), 0.1, dtype=jnp.float32)
    x2 = jax.random.normal(k_x2, (batch2, dim2), dtype=jnp.float32)

    out2 = jax.block_until_ready(planar_transformation(x2, u2, w2, b2))
    ref2 = _reference(x2, u2, w2, b2)
    assert out2.shape == (batch2, dim2)
    assert jnp.allclose(out2, ref2, atol=1e-5, rtol=1e-5), "mismatch (dim=128)"

    print("KERNEL_OK")
</pallas_src>

<mosaic_0001>
module attributes {stable_mosaic.version = 11 : i64} {
  func.func @_planar_fwd_kernel_cols(%arg0: i32, %arg1: memref<2x128xf32, #tpu.memory_space<vmem>>, %arg2: memref<2x1xf32, #tpu.memory_space<vmem>>, %arg3: memref<2x1xf32, #tpu.memory_space<vmem>>, %arg4: memref<1xf32, #tpu.memory_space<smem>>, %arg5: memref<2x128xf32, #tpu.memory_space<vmem>>) attributes {dimension_semantics = [#tpu.dimension_semantics<parallel>], iteration_bounds = array<i64: 1>, scalar_prefetch = 0 : i64, scratch_operands = 0 : i64, tpu.core_type = #tpu.core_type<tc>, window_params = [{transform_indices = @transform_0, window_bounds = array<i64: 2, 128>}, {pipeline_mode = #tpu.pipeline_mode<synchronous>, transform_indices = @transform_1, window_bounds = array<i64: 2, 1>}, {pipeline_mode = #tpu.pipeline_mode<synchronous>, transform_indices = @transform_2, window_bounds = array<i64: 2, 1>}, {transform_indices = @transform_3, window_bounds = array<i64: 1>}, {transform_indices = @transform_4, window_bounds = array<i64: 2, 128>}]} {
    %c0 = arith.constant 0 : index
    %c0_0 = arith.constant 0 : index
    %0 = vector.load %arg1[%c0, %c0_0] : memref<2x128xf32, #tpu.memory_space<vmem>>, vector<2x128xf32>
    %c0_1 = arith.constant 0 : index
    %c0_2 = arith.constant 0 : index
    %1 = vector.load %arg2[%c0_1, %c0_2] : memref<2x1xf32, #tpu.memory_space<vmem>>, vector<2x1xf32>
    %c0_3 = arith.constant 0 : index
    %c0_4 = arith.constant 0 : index
    %2 = vector.load %arg3[%c0_3, %c0_4] : memref<2x1xf32, #tpu.memory_space<vmem>>, vector<2x1xf32>
    %3 = vector.broadcast %1 : vector<2x1xf32> to vector<2x128xf32>
    %4 = arith.mulf %0, %3 : vector<2x128xf32>
    %cst = arith.constant dense<0.000000e+00> : vector<128xf32>
    %5 = vector.multi_reduction <add>, %4, %cst [0] : vector<2x128xf32> to vector<128xf32>
    %6 = vector.shape_cast %5 : vector<128xf32> to vector<1x128xf32>
    %c0_5 = arith.constant 0 : index
    %7 = memref.load %arg4[%c0_5] : memref<1xf32, #tpu.memory_space<smem>>
    %8 = vector.broadcast %7 : f32 to vector<1x128xf32>
    %9 = arith.addf %6, %8 : vector<1x128xf32>
    %10 = math.tanh %9 : vector<1x128xf32>
    %11 = vector.broadcast %2 : vector<2x1xf32> to vector<2x128xf32>
    %12 = vector.broadcast %10 : vector<1x128xf32> to vector<2x128xf32>
    %13 = arith.mulf %11, %12 : vector<2x128xf32>
    %14 = arith.addf %0, %13 : vector<2x128xf32>
    %c0_6 = arith.constant 0 : index
    %c0_7 = arith.constant 0 : index
    %15 = vector.load %arg5[%c0_6, %c0_7] : memref<2x128xf32, #tpu.memory_space<vmem>>, vector<2x128xf32>
    tpu.vector_store %arg5[%c0_6, %c0_7], %14 {strides = array<i32>} : memref<2x128xf32, #tpu.memory_space<vmem>>, vector<2x128xf32>,
    return
  }
  func.func @transform_0(%arg0: i32) -> (i32, i32) {
    %c0_i32 = arith.constant 0 : i32
    %c0_i32_0 = arith.constant 0 : i32
    return %c0_i32, %arg0 : i32, i32
  }
  func.func @transform_1(%arg0: i32) -> (i32, i32) {
    %c0_i32 = arith.constant 0 : i32
    %c0_i32_0 = arith.constant 0 : i32
    %c0_i32_1 = arith.constant 0 : i32
    return %c0_i32, %c0_i32_0 : i32, i32
  }
  func.func @transform_2(%arg0: i32) -> (i32, i32) {
    %c0_i32 = arith.constant 0 : i32
    %c0_i32_0 = arith.constant 0 : i32
    %c0_i32_1 = arith.constant 0 : i32
    return %c0_i32, %c0_i32_0 : i32, i32
  }
  func.func @transform_3(%arg0: i32) -> i32 {
    %c0_i32 = arith.constant 0 : i32
    %c0_i32_0 = arith.constant 0 : i32
    return %c0_i32 : i32
  }
  func.func @transform_4(%arg0: i32) -> (i32, i32) {
    %c0_i32 = arith.constant 0 : i32
    %c0_i32_0 = arith.constant 0 : i32
    return %c0_i32, %arg0 : i32, i32
  }
}

</mosaic_0001>

<bundles_post_ra>
// kernel: planar_transformation.1
= control target key start
LH: loop header
LB: loop body
LE: loop exit
PB: predicated region body
PF: predicated region fallthrough
CT: control target
= control target key end

     0   :  { %v55_v0 = vmov 0   ;;  %vm27_vm0 = vcmask 1041408   ;;  %s96_s1 = inlined_call_operand.vmem [shape: f32[2,1], index: 1, kind: input, shape index: {}]   ;;  %s97_s2 = inlined_call_operand.vmem [shape: f32[2,1], index: 2, kind: input, shape index: {}]   ;;  %s98_s0 = inlined_call_operand.vmem [shape: f32[2,128], index: 0, kind: input, shape index: {}]   ;;  %s99_s3 = inlined_call_operand.<no memory space> [shape: f32[1], index: 3, kind: input, shape index: {}]   ;;  %s100_s4 = inlined_call_operand.vmem [shape: f32[2,128], index: 4, kind: output, shape index: {}]  }
   0x1   :  { %52 = vset.pattern.permute.xlu0 %v55_v0  ;;  %v19_v1 = vld [vmem:[%s96_s1] sm:$0x3]  ;;  %v36_v12 = vstv %s99_s3 }
   0x2   :  { %23 = vperm.xlu0 %52, %v19_v1   ;;  %v20_v2 = vld [vmem:[%s97_s2] sm:$0x3] }
   0x3   :  { %v18_v3 = vld [vmem:[%s98_s0] sm:$0x3] }
   0x6   :  { %41 = vperm.xlu0 %52, %v20_v2  }
  0x81   :  { %v24_v4 = vpop.permute.xlu0 %23 }
  0x82   :  { %v26_v5 = vmul.f32 %v24_v4, %v18_v3 }
  0x84   :  { %v28_v6 = vsel %vm27_vm0, %v26_v5, 0.0 }
  0x85   :  { %v29_v7 = vrot.slane %v28_v6, 4  ;;  %v42_v16 = vpop.permute.xlu0 %41 }
  0x87   :  { %v30_v8 = vadd.f32 %v29_v7, %v28_v6 }
  0x89   :  { %v31_v9 = vrot.slane %v30_v8, 2 }
  0x8b   :  { %v32_v10 = vadd.f32 %v31_v9, %v30_v8 }
  0x8d   :  { %v33_v11 = vrot.slane %v32_v10, 1 }
  0x8f   :  { %v34_v13 = vadd.f32 %v33_v11, %v32_v10 }
  0x91   :  { %v37_v14 = vadd.f32 %v36_v12, %v34_v13 }
  0x93   :  { %53 = vtanh.f32 %v37_v14 }
  0x9d   :  { %v54_v15 = vpop.eup %53 }
  0x9e   :  { %v44_v17 = vmul.f32 %v54_v15, %v42_v16 }
  0xa0   :  { %v45_v18 = vadd.f32 %v44_v17, %v18_v3 }
  0xa2   :  { %46 = vst [vmem:[%s100_s4] sm:$0x3] %v45_v18 }

</bundles_post_ra>
